<compile_context>
chip_gen: v7x
topology: tpu7x:2x2x1
jax: 0.10.0
libtpu: 0.0.40
codegen_flags: <defaults>
</compile_context>

<pallas_src>
import functools
import math

import jax
import jax.numpy as jnp
from jax import lax
from jax.experimental import pallas as pl
from jax.experimental.pallas import tpu as pltpu


def _crnn_cell_kernel(z_ref, w_ref, b_ref, o_ref, *, K, H, W, HB, Ch):
    # z_ref : (1, Hp, W, K*Ctot) bf16  padded rows, kx taps folded onto lanes
    # w_ref : (K, K*Ctot, Cop)   bf16  fused complex i2h+h2h weight slab
    # b_ref : (1, Cop)           f32   combined complex biases (zero padded)
    # o_ref : (1, 2, Ch, H*W)    f32   lane-dense output (H*W on lanes)
    KC = z_ref.shape[3]
    Cop = w_ref.shape[2]
    RB = HB * W                       # output pixels per row block

    bias = b_ref[...]                 # hoisted out of the loops

    for y0 in range(0, H, HB):        # static row-block loop
        acc = None
        for ky in range(K):           # K row taps; kx already folded into KC
            # Leading-dim slice (free) + layout-preserving reshape (W is a
            # multiple of the sublane tile) -> no relayout, one MXU push.
            patch = z_ref[0, y0 + ky:y0 + ky + HB].reshape(RB, KC)
            d = jnp.dot(patch, w_ref[ky], preferred_element_type=jnp.float32)
            acc = d if acc is None else acc + d
        y = jnp.maximum(acc + bias, 0.0)          # bias + ReLU, (RB, Cop) f32
        yt = y.T                                  # (Cop, RB) for lane-dense vst
        r0 = y0 * W
        o_ref[0, 0, :, r0:r0 + RB] = yt[:Ch, :]           # real part
        o_ref[0, 1, :, r0:r0 + RB] = yt[Ch:2 * Ch, :]     # imag part


def complex_crnn_cell_pallas(x, h, params, kernel_size):
    """ComplexCRNNcell forward.  x: (N,2,Cin,H,W), h: (N,2,Ch,H,W) -> (N,2,Ch,H,W)."""
    N, _, Cin, H, W = x.shape
    Ch = h.shape[2]
    K = kernel_size
    pad = K // 2
    Hp = H + 2 * pad
    Ctot = 2 * (Cin + Ch)
    KC = K * Ctot
    Cop = max(128, ((2 * Ch + 127) // 128) * 128)   # lane-dense matmul width
    HW = H * W

    # Row-block size: ~128 output pixels per block keeps the (RB, Cop) f32
    # accumulator register-resident (<= 16 vregs).
    if W <= 128 and 128 % W == 0 and H % max(1, 128 // W) == 0:
        HB = max(1, 128 // W)
    else:
        HB = H

    # ---- glue: channels-last, concat [xr|xi|hr|hi], pad, fold kx, bf16 ------
    xl = jnp.transpose(x, (0, 1, 3, 4, 2))                       # (N,2,H,W,Cin)
    hl = jnp.transpose(h, (0, 1, 3, 4, 2))                       # (N,2,H,W,Ch)
    z = jnp.concatenate([xl[:, 0], xl[:, 1], hl[:, 0], hl[:, 1]], axis=-1)
    zp = jnp.pad(z, ((0, 0), (pad, pad), (pad, pad), (0, 0)))    # (N,Hp,Wp,Ctot)
    # x-only im2col: lane order is [kx=0 channels | kx=1 channels | ...]
    zcat = jnp.concatenate([zp[:, :, kx:kx + W, :] for kx in range(K)],
                           axis=-1).astype(jnp.bfloat16)         # (N,Hp,W,K*Ctot)

    # ---- fused weight slab: rows [kx-major x (xr|xi|hr|hi)], cols [re|im|0] --
    def hwio(w):  # OIHW -> (K, K, I, O)
        return jnp.transpose(w, (2, 3, 1, 0))

    wi_re, wi_im = hwio(params["wi_re"]), hwio(params["wi_im"])
    wh_re, wh_im = hwio(params["wh_re"]), hwio(params["wh_im"])
    wtap = jnp.concatenate([
        jnp.concatenate([wi_re,  wi_im], axis=-1),   # xr rows
        jnp.concatenate([-wi_im, wi_re], axis=-1),   # xi rows
        jnp.concatenate([wh_re,  wh_im], axis=-1),   # hr rows
        jnp.concatenate([-wh_im, wh_re], axis=-1),   # hi rows
    ], axis=2)                                       # (K, K, Ctot, 2*Ch)
    wslab = wtap.reshape(K, KC, 2 * Ch)              # kx-major rows, matches zcat
    wslab = jnp.pad(wslab, ((0, 0), (0, 0), (0, Cop - 2 * Ch)))
    wslab = wslab.astype(jnp.bfloat16)

    # effective complex-conv biases: real path b_re-b_im, imag path b_re+b_im
    b_real = (params["bi_re"] - params["bi_im"]) + (params["bh_re"] - params["bh_im"])
    b_imag = (params["bi_re"] + params["bi_im"]) + (params["bh_re"] + params["bh_im"])
    b_comb = jnp.concatenate(
        [b_real, b_imag, jnp.zeros((Cop - 2 * Ch,), jnp.float32)]
    ).reshape(1, Cop).astype(jnp.float32)

    kernel = functools.partial(_crnn_cell_kernel, K=K, H=H, W=W, HB=HB, Ch=Ch)
    out = pl.pallas_call(
        kernel,
        out_shape=jax.ShapeDtypeStruct((N, 2, Ch, HW), jnp.float32),
        grid_spec=pltpu.PrefetchScalarGridSpec(
            num_scalar_prefetch=0,
            grid=(N,),                        # batch axis, parallel for v7x TCs
            in_specs=[
                pl.BlockSpec((1, Hp, W, KC), lambda n: (n, 0, 0, 0)),
                pl.BlockSpec((K, KC, Cop), lambda n: (0, 0, 0)),
                pl.BlockSpec((1, Cop), lambda n: (0, 0)),
            ],
            out_specs=pl.BlockSpec((1, 2, Ch, HW), lambda n: (n, 0, 0, 0)),
        ),
        compiler_params=pltpu.CompilerParams(
            dimension_semantics=("parallel",)),
    )(zcat, wslab, b_comb)

    # (N, 2, Ch, H*W) -> PyTorch layout (N, 2, Ch, H, W): reshape only.
    return out.reshape(N, 2, Ch, H, W)


# ------------------------- pure-JAX reference --------------------------------
def _ref_complex_conv(x, w_re, w_im, b_re, b_im):
    # x: (N, 2, Cin, H, W); w_*: OIHW; b_*: (Cout,)
    def conv(z, w, b):
        y = lax.conv_general_dilated(
            z, w, window_strides=(1, 1), padding="SAME",
            dimension_numbers=("NCHW", "OIHW", "NCHW"))
        return y + b[None, :, None, None]

    xr, xi = x[:, 0], x[:, 1]
    yr = conv(xr, w_re, b_re) - conv(xi, w_im, b_im)
    yi = conv(xi, w_re, b_re) + conv(xr, w_im, b_im)
    return jnp.stack([yr, yi], axis=1)


def _ref_cell(x, h, params):
    i2h = _ref_complex_conv(x, params["wi_re"], params["wi_im"],
                            params["bi_re"], params["bi_im"])
    h2h = _ref_complex_conv(h, params["wh_re"], params["wh_im"],
                            params["bh_re"], params["bh_im"])
    return jnp.maximum(i2h + h2h, 0.0)


# ------------------------------------------------------------------------------
if __name__ == "__main__":
    # small shapes consistent with the module
    N, Cin, Ch, H, W, K = 2, 2, 8, 16, 16, 3

    key = jax.random.PRNGKey(0)
    ks = jax.random.split(key, 12)

    def uinit(k, shape, fan_in):
        bound = 1.0 / math.sqrt(fan_in)
        return jax.random.uniform(k, shape, jnp.float32, -bound, bound)

    fan_i = Cin * K * K
    fan_h = Ch * K * K
    params = {
        "wi_re": uinit(ks[0], (Ch, Cin, K, K), fan_i),
        "wi_im": uinit(ks[1], (Ch, Cin, K, K), fan_i),
        "bi_re": uinit(ks[2], (Ch,), fan_i),
        "bi_im": uinit(ks[3], (Ch,), fan_i),
        "wh_re": uinit(ks[4], (Ch, Ch, K, K), fan_h),
        "wh_im": uinit(ks[5], (Ch, Ch, K, K), fan_h),
        "bh_re": uinit(ks[6], (Ch,), fan_h),
        "bh_im": uinit(ks[7], (Ch,), fan_h),
    }

    # inputs in the PyTorch layout of the module: (N, 2[re/im], C, H, W)
    x = jax.random.normal(ks[8], (N, 2, Cin, H, W), jnp.float32)
    hidden = jax.random.normal(ks[9], (N, 2, Ch, H, W), jnp.float32)

    out = complex_crnn_cell_pallas(x, hidden, params, K)
    out = jax.block_until_ready(out)

    ref = jax.block_until_ready(_ref_cell(x, hidden, params))
    assert out.shape == (N, 2, Ch, H, W)
    assert jnp.allclose(out, ref, atol=3e-2, rtol=3e-2), (
        float(jnp.max(jnp.abs(out - ref))))

    print("KERNEL_OK")
</pallas_src>

<mosaic_0001>
module attributes {stable_mosaic.version = 11 : i64} {
  func.func @_crnn_cell_kernel(%arg0: i32, %arg1: memref<1x18x16x60xbf16, #tpu.memory_space<vmem>>, %arg2: memref<3x60x128xbf16, #tpu.memory_space<vmem>>, %arg3: memref<1x128xf32, #tpu.memory_space<vmem>>, %arg4: memref<1x2x8x256xf32, #tpu.memory_space<vmem>>) attributes {dimension_semantics = [#tpu.dimension_semantics<parallel>], iteration_bounds = array<i64: 2>, scalar_prefetch = 0 : i64, scratch_operands = 0 : i64, tpu.core_type = #tpu.core_type<tc>, window_params = [{transform_indices = @transform_0, window_bounds = array<i64: 1, 18, 16, 60>}, {pipeline_mode = #tpu.pipeline_mode<synchronous>, transform_indices = @transform_1, window_bounds = array<i64: 3, 60, 128>}, {pipeline_mode = #tpu.pipeline_mode<synchronous>, transform_indices = @transform_2, window_bounds = array<i64: 1, 128>}, {transform_indices = @transform_3, window_bounds = array<i64: 1, 2, 8, 256>}]} {
    %c0 = arith.constant 0 : index
    %c0_0 = arith.constant 0 : index
    %0 = vector.load %arg3[%c0, %c0_0] : memref<1x128xf32, #tpu.memory_space<vmem>>, vector<1x128xf32>
    %c0_1 = arith.constant 0 : index
    %c0_2 = arith.constant 0 : index
    %c0_3 = arith.constant 0 : index
    %c0_4 = arith.constant 0 : index
    %1 = vector.load %arg1[%c0_1, %c0_2, %c0_3, %c0_4] : memref<1x18x16x60xbf16, #tpu.memory_space<vmem>>, vector<1x8x16x60xbf16>
    %2 = vector.shape_cast %1 : vector<1x8x16x60xbf16> to vector<8x16x60xbf16>
    %3 = vector.shape_cast %2 : vector<8x16x60xbf16> to vector<128x60xbf16>
    %c0_5 = arith.constant 0 : index
    %c0_6 = arith.constant 0 : index
    %c0_7 = arith.constant 0 : index
    %4 = vector.load %arg2[%c0_5, %c0_6, %c0_7] : memref<3x60x128xbf16, #tpu.memory_space<vmem>>, vector<1x60x128xbf16>
    %5 = vector.shape_cast %4 : vector<1x60x128xbf16> to vector<60x128xbf16>
    %cst = arith.constant dense<0.000000e+00> : vector<128x128xf32>
    %6 = tpu.matmul %3, %5, %cst {dimension_numbers = #tpu.dot_dimension_numbers<[1], [0], [0], [1], [0, 0, 1, 1], [], []>} : vector<128x60xbf16>, vector<60x128xbf16>, vector<128x128xf32> -> vector<128x128xf32>
    %c0_8 = arith.constant 0 : index
    %c1 = arith.constant 1 : index
    %c0_9 = arith.constant 0 : index
    %c0_10 = arith.constant 0 : index
    %7 = vector.load %arg1[%c0_8, %c1, %c0_9, %c0_10] : memref<1x18x16x60xbf16, #tpu.memory_space<vmem>>, vector<1x8x16x60xbf16>
    %8 = vector.shape_cast %7 : vector<1x8x16x60xbf16> to vector<8x16x60xbf16>
    %9 = vector.shape_cast %8 : vector<8x16x60xbf16> to vector<128x60xbf16>
    %c1_11 = arith.constant 1 : index
    %c0_12 = arith.constant 0 : index
    %c0_13 = arith.constant 0 : index
    %10 = vector.load %arg2[%c1_11, %c0_12, %c0_13] : memref<3x60x128xbf16, #tpu.memory_space<vmem>>, vector<1x60x128xbf16>
    %11 = vector.shape_cast %10 : vector<1x60x128xbf16> to vector<60x128xbf16>
    %cst_14 = arith.constant dense<0.000000e+00> : vector<128x128xf32>
    %12 = tpu.matmul %9, %11, %cst_14 {dimension_numbers = #tpu.dot_dimension_numbers<[1], [0], [0], [1], [0, 0, 1, 1], [], []>} : vector<128x60xbf16>, vector<60x128xbf16>, vector<128x128xf32> -> vector<128x128xf32>
    %13 = arith.addf %6, %12 : vector<128x128xf32>
    %c0_15 = arith.constant 0 : index
    %c2 = arith.constant 2 : index
    %c0_16 = arith.constant 0 : index
    %c0_17 = arith.constant 0 : index
    %14 = vector.load %arg1[%c0_15, %c2, %c0_16, %c0_17] : memref<1x18x16x60xbf16, #tpu.memory_space<vmem>>, vector<1x8x16x60xbf16>
    %15 = vector.shape_cast %14 : vector<1x8x16x60xbf16> to vector<8x16x60xbf16>
    %16 = vector.shape_cast %15 : vector<8x16x60xbf16> to vector<128x60xbf16>
    %c2_18 = arith.constant 2 : index
    %c0_19 = arith.constant 0 : index
    %c0_20 = arith.constant 0 : index
    %17 = vector.load %arg2[%c2_18, %c0_19, %c0_20] : memref<3x60x128xbf16, #tpu.memory_space<vmem>>, vector<1x60x128xbf16>
    %18 = vector.shape_cast %17 : vector<1x60x128xbf16> to vector<60x128xbf16>
    %cst_21 = arith.constant dense<0.000000e+00> : vector<128x128xf32>
    %19 = tpu.matmul %16, %18, %cst_21 {dimension_numbers = #tpu.dot_dimension_numbers<[1], [0], [0], [1], [0, 0, 1, 1], [], []>} : vector<128x60xbf16>, vector<60x128xbf16>, vector<128x128xf32> -> vector<128x128xf32>
    %20 = arith.addf %13, %19 : vector<128x128xf32>
    %21 = vector.broadcast %0 : vector<1x128xf32> to vector<128x128xf32>
    %22 = arith.addf %20, %21 : vector<128x128xf32>
    %cst_22 = arith.constant 0.000000e+00 : f32
    %23 = vector.broadcast %cst_22 : f32 to vector<128x128xf32>
    %24 = arith.maximumf %22, %23 : vector<128x128xf32>
    %25 = tpu.transpose %24, [1, 0] : vector<128x128xf32> -> vector<128x128xf32>
    %26 = vector.extract_strided_slice %25 {offsets = [0, 0], sizes = [8, 128], strides = [1, 1]} : vector<128x128xf32> to vector<8x128xf32>
    %c0_23 = arith.constant 0 : index
    %c0_24 = arith.constant 0 : index
    %c0_25 = arith.constant 0 : index
    %c0_26 = arith.constant 0 : index
    %27 = vector.load %arg4[%c0_23, %c0_24, %c0_25, %c0_26] : memref<1x2x8x256xf32, #tpu.memory_space<vmem>>, vector<1x1x8x128xf32>
    %28 = vector.shape_cast %27 : vector<1x1x8x128xf32> to vector<8x128xf32>
    %29 = vector.shape_cast %26 : vector<8x128xf32> to vector<1x1x8x128xf32>
    tpu.vector_store %arg4[%c0_23, %c0_24, %c0_25, %c0_26], %29 {strides = array<i32>} : memref<1x2x8x256xf32, #tpu.memory_space<vmem>>, vector<1x1x8x128xf32>,
    %30 = vector.extract_strided_slice %25 {offsets = [8, 0], sizes = [8, 128], strides = [1, 1]} : vector<128x128xf32> to vector<8x128xf32>
    %c0_27 = arith.constant 0 : index
    %c1_28 = arith.constant 1 : index
    %c0_29 = arith.constant 0 : index
    %c0_30 = arith.constant 0 : index
    %31 = vector.load %arg4[%c0_27, %c1_28, %c0_29, %c0_30] : memref<1x2x8x256xf32, #tpu.memory_space<vmem>>, vector<1x1x8x128xf32>
    %32 = vector.shape_cast %31 : vector<1x1x8x128xf32> to vector<8x128xf32>
    %33 = vector.shape_cast %30 : vector<8x128xf32> to vector<1x1x8x128xf32>
    tpu.vector_store %arg4[%c0_27, %c1_28, %c0_29, %c0_30], %33 {strides = array<i32>} : memref<1x2x8x256xf32, #tpu.memory_space<vmem>>, vector<1x1x8x128xf32>,
    %c0_31 = arith.constant 0 : index
    %c8 = arith.constant 8 : index
    %c0_32 = arith.constant 0 : index
    %c0_33 = arith.constant 0 : index
    %34 = vector.load %arg1[%c0_31, %c8, %c0_32, %c0_33] : memref<1x18x16x60xbf16, #tpu.memory_space<vmem>>, vector<1x8x16x60xbf16>
    %35 = vector.shape_cast %34 : vector<1x8x16x60xbf16> to vector<8x16x60xbf16>
    %36 = vector.shape_cast %35 : vector<8x16x60xbf16> to vector<128x60xbf16>
    %c0_34 = arith.constant 0 : index
    %c0_35 = arith.constant 0 : index
    %c0_36 = arith.constant 0 : index
    %37 = vector.load %arg2[%c0_34, %c0_35, %c0_36] : memref<3x60x128xbf16, #tpu.memory_space<vmem>>, vector<1x60x128xbf16>
    %38 = vector.shape_cast %37 : vector<1x60x128xbf16> to vector<60x128xbf16>
    %cst_37 = arith.constant dense<0.000000e+00> : vector<128x128xf32>
    %39 = tpu.matmul %36, %38, %cst_37 {dimension_numbers = #tpu.dot_dimension_numbers<[1], [0], [0], [1], [0, 0, 1, 1], [], []>} : vector<128x60xbf16>, vector<60x128xbf16>, vector<128x128xf32> -> vector<128x128xf32>
    %c0_38 = arith.constant 0 : index
    %c9 = arith.constant 9 : index
    %c0_39 = arith.constant 0 : index
    %c0_40 = arith.constant 0 : index
    %40 = vector.load %arg1[%c0_38, %c9, %c0_39, %c0_40] : memref<1x18x16x60xbf16, #tpu.memory_space<vmem>>, vector<1x8x16x60xbf16>
    %41 = vector.shape_cast %40 : vector<1x8x16x60xbf16> to vector<8x16x60xbf16>
    %42 = vector.shape_cast %41 : vector<8x16x60xbf16> to vector<128x60xbf16>
    %c1_41 = arith.constant 1 : index
    %c0_42 = arith.constant 0 : index
    %c0_43 = arith.constant 0 : index
    %43 = vector.load %arg2[%c1_41, %c0_42, %c0_43] : memref<3x60x128xbf16, #tpu.memory_space<vmem>>, vector<1x60x128xbf16>
    %44 = vector.shape_cast %43 : vector<1x60x128xbf16> to vector<60x128xbf16>
    %cst_44 = arith.constant dense<0.000000e+00> : vector<128x128xf32>
    %45 = tpu.matmul %42, %44, %cst_44 {dimension_numbers = #tpu.dot_dimension_numbers<[1], [0], [0], [1], [0, 0, 1, 1], [], []>} : vector<128x60xbf16>, vector<60x128xbf16>, vector<128x128xf32> -> vector<128x128xf32>
    %46 = arith.addf %39, %45 : vector<128x128xf32>
    %c0_45 = arith.constant 0 : index
    %c10 = arith.constant 10 : index
    %c0_46 = arith.constant 0 : index
    %c0_47 = arith.constant 0 : index
    %47 = vector.load %arg1[%c0_45, %c10, %c0_46, %c0_47] : memref<1x18x16x60xbf16, #tpu.memory_space<vmem>>, vector<1x8x16x60xbf16>
    %48 = vector.shape_cast %47 : vector<1x8x16x60xbf16> to vector<8x16x60xbf16>
    %49 = vector.shape_cast %48 : vector<8x16x60xbf16> to vector<128x60xbf16>
    %c2_48 = arith.constant 2 : index
    %c0_49 = arith.constant 0 : index
    %c0_50 = arith.constant 0 : index
    %50 = vector.load %arg2[%c2_48, %c0_49, %c0_50] : memref<3x60x128xbf16, #tpu.memory_space<vmem>>, vector<1x60x128xbf16>
    %51 = vector.shape_cast %50 : vector<1x60x128xbf16> to vector<60x128xbf16>
    %cst_51 = arith.constant dense<0.000000e+00> : vector<128x128xf32>
    %52 = tpu.matmul %49, %51, %cst_51 {dimension_numbers = #tpu.dot_dimension_numbers<[1], [0], [0], [1], [0, 0, 1, 1], [], []>} : vector<128x60xbf16>, vector<60x128xbf16>, vector<128x128xf32> -> vector<128x128xf32>
    %53 = arith.addf %46, %52 : vector<128x128xf32>
    %54 = vector.broadcast %0 : vector<1x128xf32> to vector<128x128xf32>
    %55 = arith.addf %53, %54 : vector<128x128xf32>
    %cst_52 = arith.constant 0.000000e+00 : f32
    %56 = vector.broadcast %cst_52 : f32 to vector<128x128xf32>
    %57 = arith.maximumf %55, %56 : vector<128x128xf32>
    %58 = tpu.transpose %57, [1, 0] : vector<128x128xf32> -> vector<128x128xf32>
    %59 = vector.extract_strided_slice %58 {offsets = [0, 0], sizes = [8, 128], strides = [1, 1]} : vector<128x128xf32> to vector<8x128xf32>
    %c0_53 = arith.constant 0 : index
    %c0_54 = arith.constant 0 : index
    %c0_55 = arith.constant 0 : index
    %c128 = arith.constant 128 : index
    %60 = vector.load %arg4[%c0_53, %c0_54, %c0_55, %c128] : memref<1x2x8x256xf32, #tpu.memory_space<vmem>>, vector<1x1x8x128xf32>
    %61 = vector.shape_cast %60 : vector<1x1x8x128xf32> to vector<8x128xf32>
    %62 = vector.shape_cast %59 : vector<8x128xf32> to vector<1x1x8x128xf32>
    tpu.vector_store %arg4[%c0_53, %c0_54, %c0_55, %c128], %62 {strides = array<i32>} : memref<1x2x8x256xf32, #tpu.memory_space<vmem>>, vector<1x1x8x128xf32>,
    %63 = vector.extract_strided_slice %58 {offsets = [8, 0], sizes = [8, 128], strides = [1, 1]} : vector<128x128xf32> to vector<8x128xf32>
    %c0_56 = arith.constant 0 : index
    %c1_57 = arith.constant 1 : index
    %c0_58 = arith.constant 0 : index
    %c128_59 = arith.constant 128 : index
    %64 = vector.load %arg4[%c0_56, %c1_57, %c0_58, %c128_59] : memref<1x2x8x256xf32, #tpu.memory_space<vmem>>, vector<1x1x8x128xf32>
    %65 = vector.shape_cast %64 : vector<1x1x8x128xf32> to vector<8x128xf32>
    %66 = vector.shape_cast %63 : vector<8x128xf32> to vector<1x1x8x128xf32>
    tpu.vector_store %arg4[%c0_56, %c1_57, %c0_58, %c128_59], %66 {strides = array<i32>} : memref<1x2x8x256xf32, #tpu.memory_space<vmem>>, vector<1x1x8x128xf32>,
    return
  }
  func.func @transform_0(%arg0: i32) -> (i32, i32, i32, i32) {
    %c0_i32 = arith.constant 0 : i32
    %c0_i32_0 = arith.constant 0 : i32
    %c0_i32_1 = arith.constant 0 : i32
    %c0_i32_2 = arith.constant 0 : i32
    return %arg0, %c0_i32, %c0_i32_0, %c0_i32_1 : i32, i32, i32, i32
  }
  func.func @transform_1(%arg0: i32) -> (i32, i32, i32) {
    %c0_i32 = arith.constant 0 : i32
    %c0_i32_0 = arith.constant 0 : i32
    %c0_i32_1 = arith.constant 0 : i32
    %c0_i32_2 = arith.constant 0 : i32
    return %c0_i32, %c0_i32_0, %c0_i32_1 : i32, i32, i32
  }
  func.func @transform_2(%arg0: i32) -> (i32, i32) {
    %c0_i32 = arith.constant 0 : i32
    %c0_i32_0 = arith.constant 0 : i32
    %c0_i32_1 = arith.constant 0 : i32
    return %c0_i32, %c0_i32_0 : i32, i32
  }
  func.func @transform_3(%arg0: i32) -> (i32, i32, i32, i32) {
    %c0_i32 = arith.constant 0 : i32
    %c0_i32_0 = arith.constant 0 : i32
    %c0_i32_1 = arith.constant 0 : i32
    %c0_i32_2 = arith.constant 0 : i32
    return %arg0, %c0_i32, %c0_i32_0, %c0_i32_1 : i32, i32, i32, i32
  }
}

</mosaic_0001>

<bundles_post_ra>
// kernel: tpu_custom_call.1
= control target key start
LH: loop header
LB: loop body
LE: loop exit
PB: predicated region body
PF: predicated region fallthrough
CT: control target
= control target key end

     0   :  { %8 = vsyncpa [#allocation3], 0  ;;  %s2900_s0 = inlined_call_operand.hbm [shape: bf16[2,18,16,60], index: 0, kind: input, shape index: {}]   ;;  %s2901_s1 = inlined_call_operand.hbm [shape: bf16[3,60,128], index: 1, kind: input, shape index: {}]   ;;  %s2902_s2 = inlined_call_operand.vmem [shape: f32[1,128], index: 2, kind: input, shape index: {}]   ;;  %s2903_s3 = inlined_call_operand.hbm [shape: f32[2,2,8,256], index: 3, kind: output, shape index: {}]  }
   0x1   :  { %10 = vsyncpa [#allocation3 + $0x1], 0 }
   0x2   :  { %11 = vsyncpa [#allocation6], 0 }
   0x3   :  { %12 = vsyncpa [#allocation4], 0 }
   0x4   :  { %14 = vsyncpa [#allocation4 + $0x1], 0  ;;  %s2545_s12 = smov 0   ;;  %s2547_s13 = smov 0  }
   0x5   :  { %s2549_s14 = smov 0   ;;  %s2551_s15 = smov 0  }
   0x6 LB: > { %s2566_s16 = sadd.s32 4294967295, %s2516_s15   ;;  %s1749_s17 = sadd.s32 4294967294, %s2516_s15   ;;  %s2516_s15 = sphi %s2551_s15, %s2923_s15   ;;  %s2512_s14 = sphi %s2549_s14, %s2922_s14   ;;  %s2508_s13 = sphi %s2547_s13, %s2921_s13   ;;  %s2504_s12 = sphi %s2545_s12, %s2920_s12  }
   0x7   : > { %p40_p0 = scmp.ne.s32.totalorder %s2508_s13, %s2504_s12  ;;  %p2904_p1 = scmp.eq.s32.totalorder %s2566_s16, 0 }
   0x8   : > { %p112_p3 = scmp.eq.s32.totalorder %s1749_s17, 1  ;;  %p1750_p5 = scmp.ge.s32.totalorder %s2516_s15, 1 }
   0x9   : > { %p2575_p4 = por %p2904_p1, %p40_p0  ;;  %p119_p7 = scmp.lt.s32.totalorder %s2516_s15, 3 }
   0xa   : > { %p2580_p6 = por %p112_p3, %p40_p0  ;;  %s2518_s21 = smov [#allocation5]  }
   0xb   : > { %s2907_s18 = scalar_select %p2575_p4, 1, 0 }
   0xc   : > { %s2908_s19 = scalar_select %p2580_p6, 1, 0 }
   0xd   : > { %p2585_p8 = pnand %p1750_p5, %p119_p7  ;;  %s131_s22 = sshll.u32 %s2518_s21, 4  ;;  %s2589_s22 = int_to_ptr.vmem [resolvable:$true] %s131_s22 }
   0xe   : > { %s2601_s24 = sadd.s32 1, %s2516_s15   ;;  %s27_s25 = sadd.s32 1, %s2512_s14 }
   0xf   : > { %s2909_s20 = scalar_select %p2585_p8, 1, 0 }
  0x10   : > { %p2263_p9 = pneg %p2585_p8  ;;  %s24_s26 = ssub.s32 %s2516_s15, %s2601_s24 }
  0x11   : > { %s2388_s29 = scalar_lea.hbm %s2901_s1, 1536 }
  0x12   : > { %p2596_p11 = pnand %p2263_p9, %p2904_p1  ;;  %p2389_p12 = scmp.ne.s32.totalorder %s2901_s1, %s2388_s29 }
  0x13   : > { %p2395_p5 = scmp.lt.u32.totalorder %s2388_s29, %s2901_s1 }
  0x14   : > { %p2390_p13 = pneg %p2596_p11 }
  0x16   : > { %p2391_p0 = pnand %p2390_p13, %p2389_p12 }
  0x18   : > { %p2392_p3 = pneg %p2391_p0 }
  0x1a   : > { %p2397_p7 = pnand %p2395_p5, %p2392_p3 }
  0x1c   : > { %2400 = shalt.err (!%p2397_p7)
}
  0x1d   : > { %s2401_s7 = scalar_lea.vmem %s2589_s22, 1536  ;;  %p2409_p2 = scmp.lt.s32.totalorder %s2589_s22, %s2589_s22 }
  0x1e   : > { %p2402_p9 = scmp.ne.s32.totalorder %s2589_s22, %s2401_s7  ;;  %p2410_p6 = scmp.lt.s32.totalorder %s2401_s7, %s2401_s7 }
  0x20   : > { %p2404_p10 = pnand %p2402_p9, %p2390_p13  ;;  %p2411_p4 = por %p2410_p6, %p2409_p2 }
  0x22   : > { %p2405_p1 = pneg %p2404_p10 }
  0x24   : > { %p2412_p8 = pnand %p2411_p4, %p2405_p1 }
  0x26   : > { %2415 = shalt.err (!%p2412_p8)
}
  0x27   : > { %s2519_s8 = smov 64   ;;  %s2520_s9 = smov 4  }
  0x28   : > { %2266 = dma.hbm_to_vmem [thread:$0]  (!%p2596_p11), %s2901_s1, 1536, %s2589_s22, [#allocation6], %s2519_s8, %s2519_s8, %s2520_s9  }
  0x29   : > { %p25_p1 = scmp.eq.s32.totalorder %s24_s26, 0  ;;  %p34_p2 = scmp.ne.s32.totalorder %s2512_s14, %s2508_s13 }
  0x2a   : > { %p35_p4 = scmp.eq.s32.totalorder %s2516_s15, 0  ;;  %p2276_p6 = scmp.lt.s32.totalorder %s2516_s15, 2 }
  0x2b   : > { %s2635_s17 = scalar_select %p25_p1, %s2512_s14, %s27_s25  }
  0x2c   : > { %p36_p8 = por %p35_p4, %p34_p2  ;;  %p2911_p10 = scmp.eq.s32.totalorder %s2566_s16, 1 }
  0x2d   : > { %s148_s23 = sand.u32 1, %s2512_s14   ;;  %s2253_s27 = smul.u32 2304, %s2516_s15 }
  0x2e   : > { %p2639_p12 = por %p2911_p10, %p34_p2  ;;  %s2252_s28 = smul.u32 144, %s148_s23 }
  0x2f   : > { %p2645_p13 = pnand %p2276_p6, %p36_p8  ;;  %s2652_s25 = scalar_lea.hbm %s2900_s0, %s2253_s27 }
  0x30   : > { %s152_s30 = scalar_lea.vmem [#allocation2], %s2252_s28  ;;  %s2656_s5 = scalar_lea.sflag [#allocation3], %s148_s23 }
  0x31   : > { %s159_s4 = sshll.u32 %s152_s30, 4  ;;  %s2416_s6 = scalar_lea.hbm %s2652_s25, 2304  ;;  %s2654_s4 = int_to_ptr.vmem [resolvable:$true] %s159_s4 }
  0x32   : > { %p2417_p11 = scmp.ne.s32.totalorder %s2652_s25, %s2416_s6  ;;  %p2418_p0 = pneg %p2645_p13 }
  0x33   : > { %s2421_s11 = scalar_lea.hbm %s2900_s0, 4608  ;;  %p2422_p7 = scmp.lt.u32.totalorder %s2652_s25, %s2900_s0 }
  0x34   : > { %p2419_p3 = pnand %p2418_p0, %p2417_p11  ;;  %p2423_p9 = scmp.lt.u32.totalorder %s2421_s11, %s2416_s6 }
  0x35   : > { %p2425_p2 = scmp.lt.u32.totalorder %s2416_s6, %s2652_s25 }
  0x36   : > { %p2420_p5 = pneg %p2419_p3  ;;  %p2424_p1 = por %p2423_p9, %p2422_p7 }
  0x38   : > { %p2426_p4 = por %p2425_p2, %p2424_p1 }
  0x3a   : > { %p2427_p6 = pnand %p2426_p4, %p2420_p5 }
  0x3c   : > { %2430 = shalt.err (!%p2427_p6)
}
  0x3d   : > { %s2431_s23 = scalar_lea.vmem %s2654_s4, 2304  ;;  %s2521_s28 = smov [#allocation2]  }
  0x3e   : > { %p2432_p8 = scmp.ne.s32.totalorder %s2654_s4, %s2431_s23  ;;  %s2436_s26 = sshll.u32 %s2521_s28, 4  ;;  %s2437_s26 = int_to_ptr.vmem [resolvable:$false] %s2436_s26 }
  0x3f   : > { %s2438_s30 = scalar_lea.vmem %s2437_s26, 4608  ;;  %p2439_p3 = scmp.lt.s32.totalorder %s2654_s4, %s2437_s26 }
  0x40   : > { %p2434_p10 = pnand %p2432_p8, %p2418_p0  ;;  %p2440_p7 = scmp.lt.s32.totalorder %s2438_s30, %s2431_s23 }
  0x42   : > { %p2435_p11 = pneg %p2434_p10  ;;  %p2441_p9 = por %p2440_p7, %p2439_p3 }
  0x44   : > { %p2442_p1 = pnand %p2441_p9, %p2435_p11 }
  0x46   : > { %2445 = shalt.err (!%p2442_p1)
}
  0x47   : > { %2270 = dma.hbm_to_vmem [thread:$0]  (!%p2645_p13), %s2652_s25, 2304, %s2654_s4, %s2656_s5, %s2519_s8, %s2519_s8, %s2520_s9  }
  0x48   : > { %p2914_p0 = scmp.ne.s32.totalorder %s2909_s20, 0 }
  0x49   : > { %s2690_s6 = sand.u32 (!%p2914_p0), 1, %s2508_s13   ;;  %p2915_p5 = scmp.ne.s32.totalorder (!%p2914_p0), %s2907_s18, 0 }
  0x4a   : > { %171 = sbr.rel (%p2914_p0) target bundleno = 532 (0x214), region = 32  ;;  %s174_s10 = scalar_lea.sflag (!%p2914_p0), [#allocation3], %s2690_s6 }
  0x4b   : > { %s2254_s7 = smul.u32 (!%p2914_p0), 144, %s2690_s6 }
  0x4d   : > { %s2694_s11 = scalar_lea.vmem (!%p2914_p0), [#allocation2], %s2254_s7 }
  0x51   : > { %2491 = dma.done.wait (%p2915_p5), %s174_s10, 2304  }
  0x52   : > { %2493 = vsyncadd (%p2915_p5), %s174_s10, 4294964992  ;;  %p2916_p13 = scmp.eq.s32.totalorder %s2566_s16, 0 }
  0x54   : > { %2495 = dma.done.wait (%p2916_p13), [#allocation6], 1536   ;;  %p2917_p2 = pmov %p2916_p13 }
  0x55   : > { %v2316_v0 = vld [vmem:[#allocation5 + $0x20] sm:$0xff]   ;;  %v2318_v2 = vld [vmem:[#allocation5 + $0x28] sm:$0xff]   ;;  %v2320_v4 = vld [vmem:[#allocation5 + $0x30] sm:$0xff]   ;;  %vm319_vm0 = vcmask 490496   ;;  %vm344_vm1 = vcmask 1045504   ;;  %s1756_s8 = sshll.u32 %s2690_s6, 5 }
  0x56   : > { %2497 = vsyncadd (%p2917_p2), [#allocation6], 4294965760  ;;  %v2317_v1 = vld [vmem:[#allocation5 + $0x20] sm:$0xff]   ;;  %2038 = vmatprep.subr.bf16.mxu0 %v2316_v0  ;;  %v2319_v3 = vld [vmem:[#allocation5 + $0x28] sm:$0xff]   ;;  %s203_s9 = scalar_lea.vmem [#allocation7], %s1756_s8  ;;  %s1965_s25 = sshll.u32 %s2566_s16, 9 }
  0x57   : > { %2110 = vmatprep.subr.bf16.mxu1 %v2317_v1  ;;  %2039 = vmatpush3.bf16.msra.mxu0 %v2316_v0  ;;  %v2321_v5 = vld [vmem:[#allocation5 + $0x30] sm:$0xff]   ;;  %v2322_v6 = vld [vmem:[#allocation5 + $0x38] sm:$0x3f]   ;;  %v2327_v12 = vld [vmem:[#allocation5] sm:$0xff]   ;;  %s1666_s29 = sshll.u32 %s203_s9, 4  ;;  %s2856_s27 = scalar_lea.hbm %s2903_s3, %s1965_s25  ;;  %s2851_s29 = int_to_ptr.vmem [resolvable:$true] %s1666_s29 }
  0x58   : > { %2111 = vmatpush3.bf16.msra.mxu1 %v2317_v1  ;;  %2040 = vmatprep.subr.bf16.mxu0 %v2318_v2  ;;  %v2323_v7 = vld [vmem:[#allocation5 + $0x38] sm:$0x3f]   ;;  %v346_v10 = vsel %vm344_vm1, %v2322_v6, 0  ;;  %v2326_v11 = vld [vmem:[%s2694_s11 + $0x10] sm:$0xff]   ;;  %v2333_v18 = vld [vmem:[#allocation5 + $0x8] sm:$0xff]   ;;  %s1653_s22 = scalar_lea.sflag [#allocation4], %s2690_s6 }
  0x59   : > { %2112 = vmatprep.subr.bf16.mxu1 %v2319_v3  ;;  %v2324_v8 = vld [vmem:[%s2694_s11 + $0x8] sm:$0xff]   ;;  %v1072_v13 = vsel %vm344_vm1, %v2323_v7, 0  ;;  %v2329_v14 = vld [vmem:[#allocation5] sm:$0xff]   ;;  %v2330_v16 = vld [vmem:[%s2694_s11 + $0x18] sm:$0xff]   ;;  %s2446_s23 = scalar_lea.vmem %s2851_s29, 512  ;;  %s2522_s16 = smov [#allocation7]  }
  0x5a   : > { %v2325_v9 = vld [vmem:[%s2694_s11 + $0x48] sm:$0xff]   ;;  %2046 = vmatprep.mubr.msk.bf16.mxu0 %vm319_vm0, %v2324_v8  ;;  %v2328_v15 = vld [vmem:[%s2694_s11 + $0x50] sm:$0xff]   ;;  %v2331_v17 = vld [vmem:[%s2694_s11 + $0x58] sm:$0xff]   ;;  %p2447_p4 = scmp.ne.s32.totalorder %s2851_s29, %s2446_s23  ;;  %s2450_s28 = sshll.u32 %s2522_s16, 4  ;;  %s2451_s28 = int_to_ptr.vmem [resolvable:$false] %s2450_s28 }
  0x5b   : > { %2041 = vmatpush3.bf16.msra.mxu0 %v2318_v2  ;;  %2118 = vmatprep.mubr.msk.bf16.mxu1 %vm319_vm0, %v2325_v9  ;;  %v2335_v19 = vld [vmem:[#allocation5 + $0x8] sm:$0xff]   ;;  %v2332_v20 = vld [vmem:[%s2694_s11 + $0x20] sm:$0xff]   ;;  %v2338_v26 = vld [vmem:[%s2694_s11 + $0x30] sm:$0xff]   ;;  %s2452_s26 = scalar_lea.vmem %s2451_s28, 1024  ;;  %p2453_p10 = scmp.lt.s32.totalorder %s2851_s29, %s2451_s28 }
  0x5c   : > { %2113 = vmatpush3.bf16.msra.mxu1 %v2319_v3  ;;  %2042 = vmatprep.subr.bf16.mxu0 %v2320_v4  ;;  %v2334_v21 = vld [vmem:[%s2694_s11 + $0x60] sm:$0xff]   ;;  %v2336_v22 = vld [vmem:[%s2694_s11 + $0x28] sm:$0xff]   ;;  %v2340_v27 = vld [vmem:[%s2694_s11 + $0x70] sm:$0xff]   ;;  %p2448_p6 = pnand %p2447_p4, %p2639_p12  ;;  %p2454_p11 = scmp.lt.s32.totalorder %s2452_s26, %s2446_s23 }
  0x5d   : > { %2114 = vmatprep.subr.bf16.mxu1 %v2321_v5  ;;  %v2339_v23 = vld [vmem:[#allocation5 + $0x10] sm:$0xff]   ;;  %v2337_v24 = vld [vmem:[%s2694_s11 + $0x68] sm:$0xff]   ;;  %v2342_v29 = vld [vmem:[%s2694_s11 + $0x38] sm:$0xff]  }
  0x5e   : > { %v2341_v25 = vld [vmem:[#allocation5 + $0x10] sm:$0xff]   ;;  %v2345_v28 = vld [vmem:[#allocation5 + $0x18] sm:$0x3f]   ;;  %v2351_v34 = vld [vmem:[#allocation5 + $0x40] sm:$0xff]   ;;  %p2449_p8 = pneg %p2448_p6  ;;  %p2455_p3 = por %p2454_p11, %p2453_p10 }
  0x5f   : > { %2043 = vmatpush3.bf16.msra.mxu0 %v2320_v4  ;;  %v2347_v30 = vld [vmem:[#allocation5 + $0x18] sm:$0x3f]   ;;  %v533_v32 = vsel %vm344_vm1, %v2345_v28, 0  ;;  %v2344_v35 = vld [vmem:[%s2694_s11 + $0x40] sm:$0xff]   ;;  %v2354_v42 = vld [vmem:[%s2694_s11 + $0x10] sm:$0xff]  }
  0x60   : > { %2115 = vmatpush3.bf16.msra.mxu1 %v2321_v5  ;;  %2246 = vmatprep.subr.msk.bf16.mxu0 %vm344_vm1, %v2322_v6  ;;  %v2343_v31 = vld [vmem:[%s2694_s11 + $0x78] sm:$0xff]   ;;  %v1259_v33 = vsel %vm344_vm1, %v2347_v30, 0  ;;  %v2353_v36 = vld [vmem:[#allocation5 + $0x40] sm:$0xff]   ;;  %v2350_v40 = vld [vmem:[%s2694_s11 + $0x8] sm:$0xff]   ;;  %p2456_p7 = pnand %p2455_p3, %p2449_p8 }
  0x61   : > { %2249 = vmatprep.subr.msk.bf16.mxu1 %vm344_vm1, %v2323_v7  ;;  %v2346_v37 = vld [vmem:[%s2694_s11 + $0x80] sm:$0xff]   ;;  %v2352_v41 = vld [vmem:[%s2694_s11 + $0x48] sm:$0xff]   ;;  %v2355_v43 = vld [vmem:[%s2694_s11 + $0x50] sm:$0xff]  }
  0x62   : > { %v2348_v38 = vld [vmem:[%s2694_s11] sm:$0xff]   ;;  %v2357_v44 = vld [vmem:[#allocation5 + $0x48] sm:$0xff]   ;;  %v2369_v52 = vld [vmem:[#allocation5 + $0x58] sm:$0x3f]  }
  0x63   : > { %2045 = vmatpush3.bf16.msra.mxu0 %v346_v10  ;;  %v2349_v39 = vld [vmem:[%s2694_s11 + $0x40] sm:$0xff]   ;;  %v2359_v45 = vld [vmem:[#allocation5 + $0x48] sm:$0xff]   ;;  %v2371_v53 = vld [vmem:[#allocation5 + $0x58] sm:$0x3f]   ;;  %v746_v55 = vsel %vm344_vm1, %v2369_v52, 0 }
  0x64   : > { %2117 = vmatpush3.bf16.msra.mxu1 %v1072_v13  ;;  %2062 = vmatprep.subr.bf16.mxu0 %v2327_v12  ;;  %v2356_v46 = vld [vmem:[%s2694_s11 + $0x18] sm:$0xff]   ;;  %v2363_v47 = vld [vmem:[#allocation5 + $0x50] sm:$0xff]   ;;  %v2362_v54 = vld [vmem:[%s2694_s11 + $0x28] sm:$0xff]   ;;  %v1471_v57 = vsel %vm344_vm1, %v2371_v53, 0 }
  0x65   : > { %2134 = vmatprep.subr.bf16.mxu1 %v2329_v14  ;;  %v2365_v48 = vld [vmem:[#allocation5 + $0x50] sm:$0xff]   ;;  %v2358_v49 = vld [vmem:[%s2694_s11 + $0x58] sm:$0xff]   ;;  %v2364_v56 = vld [vmem:[%s2694_s11 + $0x68] sm:$0xff]  }
  0x66   : > { %2047 = vmatmul.mubr.msk.bf16.vlgmr.msra.gmra.mrb[0].mxu0 %vm319_vm0, %v2326_v11  ;;  %v2360_v50 = vld [vmem:[%s2694_s11 + $0x20] sm:$0xff]   ;;  %v2366_v58 = vld [vmem:[%s2694_s11 + $0x30] sm:$0xff]   ;;  %v2368_v60 = vld [vmem:[%s2694_s11 + $0x38] sm:$0xff]  }
  0x67   : > { %2119 = vmatmul.mubr.msk.bf16.vlgmr.msra.gmra.mrb[0].mxu1 %vm319_vm0, %v2328_v15  ;;  %2063 = vmatpush3.bf16.msra.mxu0 %v2327_v12  ;;  %v2361_v51 = vld [vmem:[%s2694_s11 + $0x60] sm:$0xff]   ;;  %v2367_v59 = vld [vmem:[%s2694_s11 + $0x70] sm:$0xff]   ;;  %v2370_v61 = vld [vmem:[%s2694_s11 + $0x78] sm:$0xff]  }
  0x68   : > { %2135 = vmatpush3.bf16.msra.mxu1 %v2329_v14  ;;  %2050 = vmatprep.mubr.msk.bf16.mxu0 %vm319_vm0, %v2330_v16  ;;  %v2372_v62 = vld [vmem:[%s2694_s11 + $0x10] sm:$0xff]   ;;  %v2374_v0 = vld [vmem:[%s2694_s11 + $0x18] sm:$0xff]   ;;  %v2376_v2 = vld [vmem:[%s2694_s11 + $0x20] sm:$0xff]  }
  0x69   : > { %2122 = vmatprep.mubr.msk.bf16.mxu1 %vm319_vm0, %v2331_v17  ;;  %2064 = vmatprep.subr.bf16.mxu0 %v2333_v18  ;;  %v2373_v63 = vld [vmem:[%s2694_s11 + $0x50] sm:$0xff]   ;;  %v2375_v1 = vld [vmem:[%s2694_s11 + $0x58] sm:$0xff]   ;;  %v2377_v3 = vld [vmem:[%s2694_s11 + $0x60] sm:$0xff]  }
  0x6a   : > { %2136 = vmatprep.subr.bf16.mxu1 %v2335_v19  ;;  %v2378_v4 = vld [vmem:[%s2694_s11 + $0x28] sm:$0xff]   ;;  %v2380_v6 = vld [vmem:[%s2694_s11 + $0x30] sm:$0xff]   ;;  %v2382_v8 = vld [vmem:[%s2694_s11 + $0x38] sm:$0xff]  }
  0x6b   : > { %2065 = vmatpush3.bf16.msra.mxu0 %v2333_v18  ;;  %v2379_v5 = vld [vmem:[%s2694_s11 + $0x68] sm:$0xff]   ;;  %v2381_v7 = vld [vmem:[%s2694_s11 + $0x70] sm:$0xff]   ;;  %v2383_v9 = vld [vmem:[%s2694_s11 + $0x78] sm:$0xff]  }
  0x6c   : > { %2137 = vmatpush3.bf16.msra.mxu1 %v2335_v19  ;;  %2066 = vmatprep.subr.bf16.mxu0 %v2339_v23  ;;  %v2384_v10 = vld [vmem:[%s2694_s11 + $0x40] sm:$0xff]   ;;  %v2386_v12 = vld [vmem:[%s2694_s11 + $0x48] sm:$0xff]  }
  0x6d   : > { %2138 = vmatprep.subr.bf16.mxu1 %v2341_v25  ;;  %v2385_v11 = vld [vmem:[%s2694_s11 + $0x80] sm:$0xff]   ;;  %v2387_v13 = vld [vmem:[%s2694_s11 + $0x88] sm:$0xff]  }
  0x6e   : > { %2051 = vmatmul.mubr.msk.bf16.gmra.mrb[4].mxu0 %vm319_vm0, %v2332_v20  ;;  %v2815_v14 = vld [vmem:[%s2902_s2] ss:$0 sm:$0xff] }
  0x6f   : > { %2123 = vmatmul.mubr.msk.bf16.gmra.mrb[4].mxu1 %vm319_vm0, %v2334_v21  ;;  %2054 = vmatprep.mubr.msk.bf16.mxu0 %vm319_vm0, %v2336_v22 }
  0x70   : > { %2126 = vmatprep.mubr.msk.bf16.mxu1 %vm319_vm0, %v2337_v24  ;;  %2067 = vmatpush3.bf16.msra.mxu0 %v2339_v23 }
  0x71   : > { %2139 = vmatpush3.bf16.msra.mxu1 %v2341_v25  ;;  %2247 = vmatprep.subr.msk.bf16.mxu0 %vm344_vm1, %v2345_v28 }
  0x72   : > { %2250 = vmatprep.subr.msk.bf16.mxu1 %vm344_vm1, %v2347_v30 }
  0x74   : > { %2069 = vmatpush3.bf16.msra.mxu0 %v533_v32 }
  0x75   : > { %2141 = vmatpush3.bf16.msra.mxu1 %v1259_v33  ;;  %2086 = vmatprep.subr.bf16.mxu0 %v2351_v34 }
  0x76   : > { %2055 = vmatmul.mubr.msk.bf16.gmra.mrb[8].mxu0 %vm319_vm0, %v2338_v26  ;;  %2158 = vmatprep.subr.bf16.mxu1 %v2353_v36 }
  0x77   : > { %2127 = vmatmul.mubr.msk.bf16.gmra.mrb[8].mxu1 %vm319_vm0, %v2340_v27  ;;  %2058 = vmatprep.mubr.msk.bf16.mxu0 %vm319_vm0, %v2342_v29 }
  0x78   : > { %2130 = vmatprep.mubr.msk.bf16.mxu1 %vm319_vm0, %v2343_v31 }
  0x7e   : > { %2059 = vmatmul.mubr.msk.bf16.gmra.mrb[12].mxu0 %vm319_vm0, %v2344_v35 }
  0x7f   : > { %2131 = vmatmul.mubr.msk.bf16.gmra.mrb[12].mxu1 %vm319_vm0, %v2346_v37  ;;  %2070 = vmatprep.mubr.msk.bf16.mxu0 %vm319_vm0, %v2348_v38 }
  0x80   : > { %2142 = vmatprep.mubr.msk.bf16.mxu1 %vm319_vm0, %v2349_v39 }
  0x86   : > { %2071 = vmatmul.mubr.msk.bf16.vlgmr.msra.gmra.mrb[0].mxu0 %vm319_vm0, %v2350_v40 }
  0x87   : > { %2143 = vmatmul.mubr.msk.bf16.vlgmr.msra.gmra.mrb[0].mxu1 %vm319_vm0, %v2352_v41  ;;  %2087 = vmatpush3.bf16.msra.mxu0 %v2351_v34 }
  0x88   : > { %2159 = vmatpush3.bf16.msra.mxu1 %v2353_v36  ;;  %2074 = vmatprep.mubr.msk.bf16.mxu0 %vm319_vm0, %v2354_v42 }
  0x89   : > { %2146 = vmatprep.mubr.msk.bf16.mxu1 %vm319_vm0, %v2355_v43  ;;  %2088 = vmatprep.subr.bf16.mxu0 %v2357_v44 }
  0x8a   : > { %2160 = vmatprep.subr.bf16.mxu1 %v2359_v45 }
  0x8b   : > { %2089 = vmatpush3.bf16.msra.mxu0 %v2357_v44 }
  0x8c   : > { %2161 = vmatpush3.bf16.msra.mxu1 %v2359_v45  ;;  %2090 = vmatprep.subr.bf16.mxu0 %v2363_v47 }
  0x8d   : > { %2162 = vmatprep.subr.bf16.mxu1 %v2365_v48 }
  0x8e   : > { %2075 = vmatmul.mubr.msk.bf16.gmra.mrb[4].mxu0 %vm319_vm0, %v2356_v46 }
  0x8f   : > { %2147 = vmatmul.mubr.msk.bf16.gmra.mrb[4].mxu1 %vm319_vm0, %v2358_v49  ;;  %2078 = vmatprep.mubr.msk.bf16.mxu0 %vm319_vm0, %v2360_v50 }
  0x90   : > { %2150 = vmatprep.mubr.msk.bf16.mxu1 %vm319_vm0, %v2361_v51  ;;  %2091 = vmatpush3.bf16.msra.mxu0 %v2363_v47 }
  0x91   : > { %2163 = vmatpush3.bf16.msra.mxu1 %v2365_v48  ;;  %2248 = vmatprep.subr.msk.bf16.mxu0 %vm344_vm1, %v2369_v52 }
  0x92   : > { %2251 = vmatprep.subr.msk.bf16.mxu1 %vm344_vm1, %v2371_v53 }
  0x94   : > { %2093 = vmatpush3.bf16.msra.mxu0 %v746_v55 }
  0x95   : > { %2165 = vmatpush3.bf16.msra.mxu1 %v1471_v57 }
  0x96   : > { %2079 = vmatmul.mubr.msk.bf16.gmra.mrb[8].mxu0 %vm319_vm0, %v2362_v54 }
  0x97   : > { %2151 = vmatmul.mubr.msk.bf16.gmra.mrb[8].mxu1 %vm319_vm0, %v2364_v56  ;;  %2082 = vmatprep.mubr.msk.bf16.mxu0 %vm319_vm0, %v2366_v58 }
  0x98   : > { %2154 = vmatprep.mubr.msk.bf16.mxu1 %vm319_vm0, %v2367_v59 }
  0x9e   : > { %2083 = vmatmul.mubr.msk.bf16.gmra.mrb[12].mxu0 %vm319_vm0, %v2368_v60 }
  0x9f   : > { %2155 = vmatmul.mubr.msk.bf16.gmra.mrb[12].mxu1 %vm319_vm0, %v2370_v61  ;;  %2094 = vmatprep.mubr.msk.bf16.mxu0 %vm319_vm0, %v2372_v62 }
  0xa0   : > { %2166 = vmatprep.mubr.msk.bf16.mxu1 %vm319_vm0, %v2373_v63 }
  0xa6   : > { %2095 = vmatmul.mubr.msk.bf16.vlgmr.msra.gmra.mrb[0].mxu0 %vm319_vm0, %v2374_v0 }
  0xa7   : > { %2167 = vmatmul.mubr.msk.bf16.vlgmr.msra.gmra.mrb[0].mxu1 %vm319_vm0, %v2375_v1  ;;  %2098 = vmatprep.mubr.msk.bf16.mxu0 %vm319_vm0, %v2376_v2 }
  0xa8   : > { %2170 = vmatprep.mubr.msk.bf16.mxu1 %vm319_vm0, %v2377_v3 }
  0xae   : > { %2099 = vmatmul.mubr.msk.bf16.gmra.mrb[4].mxu0 %vm319_vm0, %v2378_v4 }
  0xaf   : > { %2171 = vmatmul.mubr.msk.bf16.gmra.mrb[4].mxu1 %vm319_vm0, %v2379_v5  ;;  %2102 = vmatprep.mubr.msk.bf16.mxu0 %vm319_vm0, %v2380_v6 }
  0xb0   : > { %2174 = vmatprep.mubr.msk.bf16.mxu1 %vm319_vm0, %v2381_v7 }
  0xb6   : > { %2103 = vmatmul.mubr.msk.bf16.gmra.mrb[8].mxu0 %vm319_vm0, %v2382_v8 }
  0xb7   : > { %2175 = vmatmul.mubr.msk.bf16.gmra.mrb[8].mxu1 %vm319_vm0, %v2383_v9  ;;  %2106 = vmatprep.mubr.msk.bf16.mxu0 %vm319_vm0, %v2384_v10 }
  0xb8   : > { %2178 = vmatprep.mubr.msk.bf16.mxu1 %vm319_vm0, %v2385_v11 }
  0xbe   : > { %2107 = vmatmul.mubr.msk.bf16.gmra.mrb[12].mxu0 %vm319_vm0, %v2386_v12 }
  0xbf   : > { %2179 = vmatmul.mubr.msk.bf16.gmra.mrb[12].mxu1 %vm319_vm0, %v2387_v13 }
 0x179   : > { %v2096_v15 = vpop.f32.mrb[0].mxu0 }
 0x17a   : > { %v2168_v16 = vpop.f32.mrb[0].mxu1  ;;  %v782_v17 = vpop.f32.mrb[1].mxu0  ;;  %v869_v29 = vadd.f32 %v2096_v15, %v2815_v14 }
 0x17b   : > { %v1507_v18 = vpop.f32.mrb[1].mxu1  ;;  %v2097_v19 = vpop.f32.mrb[2].mxu0  ;;  %v867_v20 = vadd.f32 %v2815_v14, %v782_v17  ;;  %v1588_v32 = vadd.f32 %v2168_v16, %v2815_v14 }
 0x17c   : > { %v2169_v21 = vpop.f32.mrb[2].mxu1  ;;  %v785_v22 = vpop.f32.mrb[3].mxu0  ;;  %v1586_v23 = vadd.f32 %v2815_v14, %v1507_v18  ;;  %v885_v40 = vmax.f32 %v869_v29, 0.0  ;;  %v870_v41 = vadd.f32 %v2097_v19, %v2815_v14 }
 0x17d   : > { %v868_v24 = vadd.f32 %v2815_v14, %v785_v22  ;;  %v1510_v25 = vpop.f32.mrb[3].mxu1  ;;  %v883_v26 = vmax.f32 %v867_v20, 0.0  ;;  %v1604_v43 = vmax.f32 %v1588_v32, 0.0  ;;  %v1589_v44 = vadd.f32 %v2169_v21, %v2815_v14 }
 0x17e   : > { %v1587_v27 = vadd.f32 %v2815_v14, %v1510_v25  ;;  %v1602_v28 = vmax.f32 %v1586_v23, 0.0  ;;  %v886_v45 = vmax.f32 %v870_v41, 0.0 }
 0x17f   : > { %899 = vxpose.xlu0.b32.start [1/16] (narrow) %v883_v26, 16  ;;  %v884_v30 = vmax.f32 %v868_v24, 0.0  ;;  %v1605_v48 = vmax.f32 %v1589_v44, 0.0 }
 0x180   : > { %1618 = vxpose.xlu1.b32.start [1/16] (narrow) %v1602_v28, 16  ;;  %v1603_v33 = vmax.f32 %v1587_v27, 0.0 }
 0x181   : > { %v2100_v31 = vpop.f32.mrb[4].mxu0 }
 0x182   : > { %v2172_v34 = vpop.f32.mrb[4].mxu1  ;;  %v798_v35 = vpop.f32.mrb[5].mxu0  ;;  %v873_v61 = vadd.f32 %v2100_v31, %v2815_v14 }
 0x183   : > { %v1523_v36 = vpop.f32.mrb[5].mxu1  ;;  %v2101_v37 = vpop.f32.mrb[6].mxu0  ;;  %900 = vxpose.xlu0.b32.cont [2/16] (narrow) %v884_v30, 16  ;;  %v871_v46 = vadd.f32 %v2815_v14, %v798_v35  ;;  %v1592_v0 = vadd.f32 %v2172_v34, %v2815_v14 }
 0x184   : > { %v2173_v38 = vpop.f32.mrb[6].mxu1  ;;  %1619 = vxpose.xlu1.b32.cont [2/16] (narrow) %v1603_v33, 16  ;;  %v801_v39 = vpop.f32.mrb[7].mxu0  ;;  %v1590_v49 = vadd.f32 %v2815_v14, %v1523_v36  ;;  %v889_v8 = vmax.f32 %v873_v61, 0.0  ;;  %v874_v9 = vadd.f32 %v2101_v37, %v2815_v14 }
 0x185   : > { %v1526_v42 = vpop.f32.mrb[7].mxu1  ;;  %v887_v56 = vmax.f32 %v871_v46, 0.0  ;;  %v872_v57 = vadd.f32 %v2815_v14, %v801_v39  ;;  %v1608_v11 = vmax.f32 %v1592_v0, 0.0  ;;  %v1593_v12 = vadd.f32 %v2173_v38, %v2815_v14 }
 0x186   : > { %v1606_v59 = vmax.f32 %v1590_v49, 0.0  ;;  %v1591_v60 = vadd.f32 %v2815_v14, %v1526_v42  ;;  %v890_v13 = vmax.f32 %v874_v9, 0.0 }
 0x187   : > { %901 = vxpose.xlu0.b32.cont [3/16] (narrow) %v885_v40, 16  ;;  %v888_v62 = vmax.f32 %v872_v57, 0.0  ;;  %v1609_v16 = vmax.f32 %v1593_v12, 0.0 }
 0x188   : > { %1620 = vxpose.xlu1.b32.cont [3/16] (narrow) %v1604_v43, 16  ;;  %v1607_v1 = vmax.f32 %v1591_v60, 0.0 }
 0x189   : > { %v2104_v47 = vpop.f32.mrb[8].mxu0 }
 0x18a   : > { %v2176_v50 = vpop.f32.mrb[8].mxu1  ;;  %v814_v51 = vpop.f32.mrb[9].mxu0  ;;  %v877_v22 = vadd.f32 %v2104_v47, %v2815_v14 }
 0x18b   : > { %v1539_v52 = vpop.f32.mrb[9].mxu1  ;;  %v2105_v53 = vpop.f32.mrb[10].mxu0  ;;  %902 = vxpose.xlu0.b32.cont [4/16] (narrow) %v886_v45, 16  ;;  %v875_v15 = vadd.f32 %v2815_v14, %v814_v51  ;;  %v1596_v24 = vadd.f32 %v2176_v50, %v2815_v14 }
 0x18c   : > { %v2177_v54 = vpop.f32.mrb[10].mxu1  ;;  %1621 = vxpose.xlu1.b32.cont [4/16] (narrow) %v1605_v48, 16  ;;  %v817_v55 = vpop.f32.mrb[11].mxu0  ;;  %v1594_v17 = vadd.f32 %v2815_v14, %v1539_v52  ;;  %v893_v26 = vmax.f32 %v877_v22, 0.0  ;;  %v878_v27 = vadd.f32 %v2105_v53, %v2815_v14 }
 0x18d   : > { %v1542_v58 = vpop.f32.mrb[11].mxu1  ;;  %v891_v18 = vmax.f32 %v875_v15, 0.0  ;;  %v876_v19 = vadd.f32 %v2815_v14, %v817_v55  ;;  %v1612_v28 = vmax.f32 %v1596_v24, 0.0  ;;  %v1597_v29 = vadd.f32 %v2177_v54, %v2815_v14 }
 0x18e   : > { %v1610_v20 = vmax.f32 %v1594_v17, 0.0  ;;  %v1595_v21 = vadd.f32 %v2815_v14, %v1542_v58  ;;  %v894_v30 = vmax.f32 %v878_v27, 0.0 }
 0x18f   : > { %903 = vxpose.xlu0.b32.cont [5/16] (narrow) %v887_v56, 16  ;;  %v892_v23 = vmax.f32 %v876_v19, 0.0  ;;  %v1613_v32 = vmax.f32 %v1597_v29, 0.0 }
 0x190   : > { %1622 = vxpose.xlu1.b32.cont [5/16] (narrow) %v1606_v59, 16  ;;  %v1611_v25 = vmax.f32 %v1595_v21, 0.0 }
 0x191   : > { %v2108_v63 = vpop.f32.mrb[12].mxu0 }
 0x192   : > { %v2180_v2 = vpop.f32.mrb[12].mxu1  ;;  %v830_v3 = vpop.f32.mrb[13].mxu0  ;;  %v881_v38 = vadd.f32 %v2108_v63, %v2815_v14 }
 0x193   : > { %v1555_v4 = vpop.f32.mrb[13].mxu1  ;;  %v2109_v5 = vpop.f32.mrb[14].mxu0  ;;  %904 = vxpose.xlu0.b32.cont [6/16] (narrow) %v888_v62, 16  ;;  %v879_v31 = vadd.f32 %v2815_v14, %v830_v3  ;;  %v1600_v40 = vadd.f32 %v2180_v2, %v2815_v14 }
 0x194   : > { %v2181_v6 = vpop.f32.mrb[14].mxu1  ;;  %1623 = vxpose.xlu1.b32.cont [6/16] (narrow) %v1607_v1, 16  ;;  %v833_v7 = vpop.f32.mrb[15].mxu0  ;;  %v1598_v33 = vadd.f32 %v2815_v14, %v1555_v4  ;;  %v897_v42 = vmax.f32 %v881_v38, 0.0  ;;  %v882_v43 = vadd.f32 %v2109_v5, %v2815_v14 }
 0x195   : > { %v1558_v10 = vpop.f32.mrb[15].mxu1  ;;  %v895_v34 = vmax.f32 %v879_v31, 0.0  ;;  %v880_v35 = vadd.f32 %v2815_v14, %v833_v7  ;;  %v1616_v44 = vmax.f32 %v1600_v40, 0.0  ;;  %v1601_v45 = vadd.f32 %v2181_v6, %v2815_v14 }
 0x196   : > { %v1614_v36 = vmax.f32 %v1598_v33, 0.0  ;;  %v1599_v37 = vadd.f32 %v2815_v14, %v1558_v10  ;;  %v898_v46 = vmax.f32 %v882_v43, 0.0 }
 0x197   : > { %905 = vxpose.xlu0.b32.cont [7/16] (narrow) %v889_v8, 16  ;;  %v896_v39 = vmax.f32 %v880_v35, 0.0  ;;  %v1617_v47 = vmax.f32 %v1601_v45, 0.0 }
 0x198   : > { %1624 = vxpose.xlu1.b32.cont [7/16] (narrow) %v1608_v11, 16  ;;  %v1615_v41 = vmax.f32 %v1599_v37, 0.0 }
 0x19b   : > { %906 = vxpose.xlu0.b32.cont [8/16] (narrow) %v890_v13, 16 }
 0x19c   : > { %1625 = vxpose.xlu1.b32.cont [8/16] (narrow) %v1609_v16, 16 }
 0x19f   : > { %907 = vxpose.xlu0.b32.cont [9/16] (narrow) %v891_v18, 16 }
 0x1a0   : > { %1626 = vxpose.xlu1.b32.cont [9/16] (narrow) %v1610_v20, 16 }
 0x1a3   : > { %908 = vxpose.xlu0.b32.cont [10/16] (narrow) %v892_v23, 16 }
 0x1a4   : > { %1627 = vxpose.xlu1.b32.cont [10/16] (narrow) %v1611_v25, 16 }
 0x1a7   : > { %909 = vxpose.xlu0.b32.cont [11/16] (narrow) %v893_v26, 16 }
 0x1a8   : > { %1628 = vxpose.xlu1.b32.cont [11/16] (narrow) %v1612_v28, 16 }
 0x1ab   : > { %910 = vxpose.xlu0.b32.cont [12/16] (narrow) %v894_v30, 16 }
 0x1ac   : > { %1629 = vxpose.xlu1.b32.cont [12/16] (narrow) %v1613_v32, 16 }
 0x1af   : > { %911 = vxpose.xlu0.b32.cont [13/16] (narrow) %v895_v34, 16 }
 0x1b0   : > { %1630 = vxpose.xlu1.b32.cont [13/16] (narrow) %v1614_v36, 16 }
 0x1b3   : > { %912 = vxpose.xlu0.b32.cont [14/16] (narrow) %v896_v39, 16 }
 0x1b4   : > { %1631 = vxpose.xlu1.b32.cont [14/16] (narrow) %v1615_v41, 16 }
 0x1b7   : > { %913 = vxpose.xlu0.b32.cont [15/16] (narrow) %v897_v42, 16 }
 0x1b8   : > { %1632 = vxpose.xlu1.b32.cont [15/16] (narrow) %v1616_v44, 16 }
 0x1bb   : > { %914 = vxpose.xlu0.b32.end [16/16] (narrow) %v898_v46, 16 }
 0x1bc   : > { %1633 = vxpose.xlu1.b32.end [16/16] (narrow) %v1617_v47, 16 }
 0x1ff   : > { %v915_v48 = vpop.trf.xlu0 }
 0x200   : > { %v1634_v49 = vpop.trf.xlu1  ;;  %931 = vst [vmem:[%s203_s9] sm:$0xff] %v915_v48 }
 0x201   : > { %1650 = vst [vmem:[%s203_s9 + $0x8] sm:$0xff] %v1634_v49 }
 0x203   : > { %v916_v14 = vpop.trf.xlu0 }
 0x204   : > { %v1635_v50 = vpop.trf.xlu1  ;;  %1850 = vst [vmem:[%s203_s9 + $0x10] sm:$0xff] %v916_v14 }
 0x205   : > { %1959 = vst [vmem:[%s203_s9 + $0x18] sm:$0xff] %v1635_v50 }
 0x206   : > { %2459 = shalt.err (!%p2456_p7)
}
 0x207   : > { %s2460_s30 = scalar_lea.hbm %s2856_s27, 512  ;;  %s2464_s11 = scalar_lea.hbm %s2903_s3, 1024 }
 0x208   : > { %p2461_p9 = scmp.ne.s32.totalorder %s2856_s27, %s2460_s30  ;;  %p2465_p5 = scmp.lt.u32.totalorder %s2856_s27, %s2903_s3 }
 0x209   : > { %p2466_p13 = scmp.lt.u32.totalorder %s2464_s11, %s2460_s30  ;;  %p2468_p4 = scmp.lt.u32.totalorder %s2460_s30, %s2856_s27 }
 0x20a   : > { %p2462_p1 = pnand %p2461_p9, %p2639_p12 }
 0x20b   : > { %p2467_p2 = por %p2466_p13, %p2465_p5 }
 0x20c   : > { %p2463_p0 = pneg %p2462_p1 }
 0x20d   : > { %p2469_p6 = por %p2468_p4, %p2467_p2 }
 0x20f   : > { %p2470_p8 = pnand %p2469_p6, %p2463_p0 }
 0x211   : > { %2473 = shalt.err (!%p2470_p8)
}
 0x212   : > { %s2523_s8 = smov 256   ;;  %s2524_s9 = smov 16  }
 0x213   : > { %2261 = dma.vmem_to_hbm [thread:$0]  (%p2639_p12), %s2851_s29, 512, %s2856_s27, %s1653_s22, %s2523_s8, %s2523_s8, %s2524_s9  }
 0x214 PF: > { %s1681_s25 = sand.u32 1, %s2504_s12   ;;  %p2918_p10 = scmp.ne.s32.totalorder %s2908_s19, 0 }
 0x215   : > { %p2919_p11 = scmp.ge.s32.totalorder %s2516_s15, 2  ;;  %s1682_s4 = scalar_lea.sflag [#allocation4], %s1681_s25 }
 0x217   : > { %p2272_p3 = pnand %p2919_p11, %p2918_p10 }
 0x219   : > { %2499 = dma.done.wait (!%p2272_p3), %s1682_s4, 512  }
 0x21a   : > { %2501 = vsyncadd (!%p2272_p3), %s1682_s4, 4294966784  ;;  %p17_p7 = scmp.ge.s32.totalorder %s2601_s24, 4   ;;  %s2920_s12 = smov %s2508_s13 }
 0x21b   : > { %s2921_s13 = smov %s2512_s14  ;;  %s2922_s14 = smov %s2635_s17 }
 0x21c   : > { %s2923_s15 = smov %s2601_s24  ;;  %19 = sbr.rel (!%p17_p7) target bundleno = 6 (0x6), region = 89 }
 0x223   :  { %1687 = vsyncpa [#allocation3], 1 }
 0x224   :  { %1689 = vsyncpa [#allocation3 + $0x1], 1 }
 0x225   :  { %1690 = vsyncpa [#allocation6], 1 }
 0x226   :  { %1691 = vsyncpa [#allocation4], 1 }
 0x227   :  { %1693 = vsyncpa [#allocation4 + $0x1], 1 }

</bundles_post_ra>
